<compile_context>
chip_gen: v5e
topology: v5e:2x2
jax: 0.10.0
libtpu: 0.0.40
codegen_flags: <defaults>
</compile_context>

<pallas_src>
import functools
import math

import jax
import jax.numpy as jnp
from jax import lax
from jax.experimental import pallas as pl
from jax.experimental.pallas import tpu as pltpu

LN_EPS = 1e-5
NEG_INF = -1e30  # finite large negative: avoids NaN from (-inf) - (-inf)


# --------------------------------------------------------------------------
# Hardware-aware tiling configuration
# --------------------------------------------------------------------------
def _hw_config():
    try:
        cap = int(pltpu.get_tpu_info().vmem_capacity_bytes)
    except Exception:
        cap = 64 * 1024 * 1024
    if cap >= 100 * 1024 * 1024:
        # v5e / v6e class parts (128 MiB VMEM): big tiles, high scoped limit.
        return {"tm": 512, "tn": 512, "tk": 1024, "vmem": 96 * 1024 * 1024}
    # v7x class parts (64 MiB physical VMEM): smaller tiles, <= 48 MiB scoped limit.
    return {"tm": 256, "tn": 256, "tk": 512,
            "vmem": min(48 * 1024 * 1024, int(cap * 3 // 4))}


_HW = _hw_config()


def _cp(sem):
    return pltpu.CompilerParams(dimension_semantics=sem,
                                vmem_limit_bytes=_HW["vmem"])


def _tile(dim, target, align):
    """Largest multiple-of-`align` divisor of dim that is <= target, else full dim."""
    if dim <= target:
        return dim
    t = (target // align) * align
    while t >= align:
        if dim % t == 0:
            return t
        t -= align
    return dim  # no aligned divisor: a full-dim block is always legal


# --------------------------------------------------------------------------
# Tiled matmul kernels (bf16 inputs, f32 accumulation, fused epilogues)
# --------------------------------------------------------------------------
def _mm_kernel(x_ref, w_ref, o_ref, acc_ref):
    @pl.when(pl.program_id(2) == 0)
    def _():
        acc_ref[...] = jnp.zeros_like(acc_ref)

    acc_ref[...] += jnp.dot(x_ref[...], w_ref[...],
                            preferred_element_type=jnp.float32)

    @pl.when(pl.program_id(2) == pl.num_programs(2) - 1)
    def _():
        o_ref[...] = acc_ref[...].astype(o_ref.dtype)


def _mm_bias_kernel(x_ref, w_ref, b_ref, o_ref, acc_ref, *, relu):
    @pl.when(pl.program_id(2) == 0)
    def _():
        acc_ref[...] = jnp.zeros_like(acc_ref)

    acc_ref[...] += jnp.dot(x_ref[...], w_ref[...],
                            preferred_element_type=jnp.float32)

    @pl.when(pl.program_id(2) == pl.num_programs(2) - 1)
    def _():
        y = acc_ref[...] + b_ref[...]
        if relu:
            y = jnp.maximum(y, 0.0)
        o_ref[...] = y.astype(o_ref.dtype)


def _mm_res_ln_kernel(x_ref, w_ref, b_ref, res_ref, g_ref, beta_ref, o_ref,
                      acc_ref, *, eps):
    # grid = (M_tiles, K_tiles); N kept whole so the LayerNorm reduction is local.
    @pl.when(pl.program_id(1) == 0)
    def _():
        acc_ref[...] = jnp.zeros_like(acc_ref)

    acc_ref[...] += jnp.dot(x_ref[...], w_ref[...],
                            preferred_element_type=jnp.float32)

    @pl.when(pl.program_id(1) == pl.num_programs(1) - 1)
    def _():
        z = acc_ref[...] + b_ref[...] + res_ref[...].astype(jnp.float32)
        mu = jnp.mean(z, axis=-1, keepdims=True)
        var = jnp.mean(jnp.square(z - mu), axis=-1, keepdims=True)
        zn = (z - mu) * lax.rsqrt(var + eps)
        o_ref[...] = (zn * g_ref[...] + beta_ref[...]).astype(o_ref.dtype)


def matmul(x, w, out_dtype=jnp.bfloat16):
    M, K = x.shape
    N = w.shape[1]
    tm = _tile(M, _HW["tm"], 8)
    tn = _tile(N, _HW["tn"], 128)
    tk = _tile(K, _HW["tk"], 128)
    return pl.pallas_call(
        _mm_kernel,
        out_shape=jax.ShapeDtypeStruct((M, N), out_dtype),
        grid=(M // tm, N // tn, K // tk),
        in_specs=[
            pl.BlockSpec((tm, tk), lambda i, j, k: (i, k)),
            pl.BlockSpec((tk, tn), lambda i, j, k: (k, j)),
        ],
        out_specs=pl.BlockSpec((tm, tn), lambda i, j, k: (i, j)),
        scratch_shapes=[pltpu.VMEM((tm, tn), jnp.float32)],
        compiler_params=_cp(("parallel", "parallel", "arbitrary")),
    )(x, w)


def matmul_bias(x, w, b, relu=False, out_dtype=jnp.bfloat16):
    M, K = x.shape
    N = w.shape[1]
    tm = _tile(M, _HW["tm"], 8)
    tn = _tile(N, _HW["tn"], 128)
    tk = _tile(K, _HW["tk"], 128)
    return pl.pallas_call(
        functools.partial(_mm_bias_kernel, relu=relu),
        out_shape=jax.ShapeDtypeStruct((M, N), out_dtype),
        grid=(M // tm, N // tn, K // tk),
        in_specs=[
            pl.BlockSpec((tm, tk), lambda i, j, k: (i, k)),
            pl.BlockSpec((tk, tn), lambda i, j, k: (k, j)),
            pl.BlockSpec((1, tn), lambda i, j, k: (0, j)),
        ],
        out_specs=pl.BlockSpec((tm, tn), lambda i, j, k: (i, j)),
        scratch_shapes=[pltpu.VMEM((tm, tn), jnp.float32)],
        compiler_params=_cp(("parallel", "parallel", "arbitrary")),
    )(x, w, b)


def matmul_res_ln(x, w, b, res, gamma, beta, out_dtype=jnp.float32):
    """LayerNorm((x @ w) + b + res) * gamma + beta, fused epilogue."""
    M, K = x.shape
    N = w.shape[1]
    tm = _tile(M, _HW["tm"], 8)
    tk = _tile(K, _HW["tk"], 128)
    # TODO(synk): for very large d_model on 64 MiB-VMEM parts, tile N and compute LN
    #             stats with a two-pass (sum / sum-of-squares) epilogue.
    return pl.pallas_call(
        functools.partial(_mm_res_ln_kernel, eps=LN_EPS),
        out_shape=jax.ShapeDtypeStruct((M, N), out_dtype),
        grid=(M // tm, K // tk),
        in_specs=[
            pl.BlockSpec((tm, tk), lambda i, k: (i, k)),
            pl.BlockSpec((tk, N), lambda i, k: (k, 0)),
            pl.BlockSpec((1, N), lambda i, k: (0, 0)),
            pl.BlockSpec((tm, N), lambda i, k: (i, 0)),
            pl.BlockSpec((1, N), lambda i, k: (0, 0)),
            pl.BlockSpec((1, N), lambda i, k: (0, 0)),
        ],
        out_specs=pl.BlockSpec((tm, N), lambda i, k: (i, 0)),
        scratch_shapes=[pltpu.VMEM((tm, N), jnp.float32)],
        compiler_params=_cp(("parallel", "arbitrary")),
    )(x, w, b, res, gamma, beta)


# --------------------------------------------------------------------------
# Fused relative multi-head attention kernel  (grid = (B, H, q_tiles))
# --------------------------------------------------------------------------
def _rel_attn_kernel(q_ref, k_ref, v_ref, rk_ref, rw_ref, rr_ref, o_ref,
                     *, scale, q_len):
    # q_ref: (tq, D) bf16;  k_ref / v_ref: (K, D) bf16;  rk_ref: (R, D) bf16
    # rw_ref / rr_ref: (1, D) f32;  o_ref: (tq, D)
    tq, _ = q_ref.shape
    K = k_ref.shape[0]
    R = rk_ref.shape[0]
    row0 = pl.program_id(2) * tq

    # Causal mask built on-chip (standard Transformer-XL mask, mems=None).
    row = row0 + lax.broadcasted_iota(jnp.int32, (tq, K), 0)
    col = lax.broadcasted_iota(jnp.int32, (tq, K), 1)
    masked = col > row + (K - q_len)

    # Fold the softmax scale into the query side (VALU work on (tq, D) not (tq, K)).
    qf = q_ref[...].astype(jnp.float32)
    q_ac = ((qf + rw_ref[...]) * scale).astype(jnp.bfloat16)
    q_bd = ((qf + rr_ref[...]) * scale).astype(jnp.bfloat16)

    dn_nt = (((1,), (1,)), ((), ()))  # contract last dims (no explicit transpose)
    dn_nn = (((1,), (0,)), ((), ()))

    ac = lax.dot_general(q_ac, k_ref[...], dn_nt,
                         preferred_element_type=jnp.float32)   # (tq, K)
    bd = lax.dot_general(q_bd, rk_ref[...], dn_nt,
                         preferred_element_type=jnp.float32)   # (tq, R)

    # On-chip _rel_shift: absolute row i needs bd[., j + (q_len-1-i)].  Decompose the
    # per-row left rotation into log2(q_len) power-of-two rotations + selects; wrapped
    # values only land in causally-masked slots (valid because R == K == q_len).
    # TODO(synk): generalize (or guard) the shift for mems != None (klen > qlen).
    shift_amt = (q_len - 1) - (row0 + lax.broadcasted_iota(jnp.int32, (tq, 1), 0))
    use_xlu_roll = (R % 128 == 0)  # XLU vrot needs a lane-aligned rotation width
    shifted = bd
    sh = 1
    while sh < q_len:
        if use_xlu_roll:
            rolled = pltpu.roll(shifted, shift=(R - sh) % R, axis=1)
        else:
            rolled = jnp.concatenate([shifted[:, sh:], shifted[:, :sh]], axis=1)
        shifted = jnp.where((shift_amt & sh) != 0, rolled, shifted)
        sh *= 2

    s = ac + shifted
    s = jnp.where(masked, NEG_INF, s)
    s = s - jnp.max(s, axis=1, keepdims=True)
    p = jnp.exp(s)
    denom = jnp.sum(p, axis=1, keepdims=True)
    # Normalize AFTER P@V: the divide touches a (tq, D) tile, not (tq, K), and the
    # approximate reciprocal runs on the EUP slot.
    acc = lax.dot_general(p.astype(jnp.bfloat16), v_ref[...], dn_nn,
                          preferred_element_type=jnp.float32)  # (tq, D)
    o_ref[...] = (acc * pl.reciprocal(denom, approx=True)).astype(o_ref.dtype)


def rel_attention(qkv, r_head_k, r_w_bias, r_r_bias, scale):
    # qkv: [3, B, H, Q, D] bf16; r_head_k: [H, R, D] bf16; biases: [H, 1, D] f32
    # returns [B, H, Q, D] bf16.
    _, B, H, Q, D = qkv.shape
    R = r_head_k.shape[1]
    tq = _tile(Q, 256, 8)
    n_qt = Q // tq
    # TODO(synk): for very long sequences add k-tiling with online-softmax scratch.
    return pl.pallas_call(
        functools.partial(_rel_attn_kernel, scale=scale, q_len=Q),
        out_shape=jax.ShapeDtypeStruct((B, H, Q, D), jnp.bfloat16),
        grid=(B, H, n_qt),
        in_specs=[
            pl.BlockSpec((None, None, None, tq, D), lambda b, h, t: (0, b, h, t, 0)),
            pl.BlockSpec((None, None, None, Q, D), lambda b, h, t: (1, b, h, 0, 0)),
            pl.BlockSpec((None, None, None, Q, D), lambda b, h, t: (2, b, h, 0, 0)),
            pl.BlockSpec((None, R, D), lambda b, h, t: (h, 0, 0)),
            pl.BlockSpec((None, 1, D), lambda b, h, t: (h, 0, 0)),
            pl.BlockSpec((None, 1, D), lambda b, h, t: (h, 0, 0)),
        ],
        out_specs=pl.BlockSpec((None, None, tq, D), lambda b, h, t: (b, h, t, 0)),
        compiler_params=_cp(("parallel", "parallel", "parallel")),
    )(qkv, qkv, qkv, r_head_k, r_w_bias, r_r_bias)


# --------------------------------------------------------------------------
# Decoder layer
# --------------------------------------------------------------------------
def rel_partial_decoder_layer(params, dec_inp, r, r_w_bias, r_r_bias,
                              dec_attn_mask=None):
    # TODO(synk): dropout/dropatt are identity (inference); mems=None path only;
    #             the fused kernel assumes the standard causal dec_attn_mask.
    Q, B, d_model = dec_inp.shape
    R = r.shape[0]
    H, D = r_w_bias.shape
    scale = 1.0 / math.sqrt(D)
    bf16 = jnp.bfloat16

    # Rows stay in (q, b) order end-to-end, so no entry/exit transpose of the
    # activations is needed ([Q,B,D] <-> [Q*B,D] reshape is free).
    x2d = dec_inp.reshape(Q * B, d_model)               # f32 residual
    x2d_bf = x2d.astype(bf16)

    # ---- projections (tiled Pallas matmuls, bf16 in / f32 acc / bf16 out) ----
    w_heads = matmul(x2d_bf, params["w_qkv"].astype(bf16))          # [Q*B, 3*H*D]
    r_head_k = matmul(r.astype(bf16), params["w_r"].astype(bf16))   # [R, H*D]

    # Head-major layout so the attention kernel sees contiguous lane-dense (Q, D)
    # blocks per (batch, head).
    # TODO(synk): fold these layout passes into the projection matmuls' out_specs.
    qkv = jnp.transpose(w_heads.reshape(Q, B, 3, H, D), (2, 1, 3, 0, 4))  # [3,B,H,Q,D]
    rk = jnp.transpose(r_head_k.reshape(R, H, D), (1, 0, 2))              # [H,R,D]

    # ---- fused relative attention (AC + shifted BD + mask + softmax + @V) ----
    attn = rel_attention(qkv, rk,
                         r_w_bias.reshape(H, 1, D).astype(jnp.float32),
                         r_r_bias.reshape(H, 1, D).astype(jnp.float32),
                         scale)                                     # [B,H,Q,D] bf16
    attn2d = jnp.transpose(attn, (2, 0, 1, 3)).reshape(Q * B, H * D)

    # ---- o-proj + residual + LayerNorm (fused), then FF with fused epilogues ----
    zero_b = jnp.zeros((1, d_model), jnp.float32)
    attn_ln = matmul_res_ln(attn2d, params["w_o"].astype(bf16), zero_b, x2d,
                            params["ln1_g"], params["ln1_b"], out_dtype=bf16)
    h1 = matmul_bias(attn_ln, params["w_ff1"].astype(bf16), params["b_ff1"],
                     relu=True)
    out2d = matmul_res_ln(h1, params["w_ff2"].astype(bf16), params["b_ff2"],
                          attn_ln, params["ln2_g"], params["ln2_b"],
                          out_dtype=jnp.float32)

    return out2d.reshape(Q, B, d_model)


# --------------------------------------------------------------------------
# Pure-JAX reference (mirrors the PyTorch forward), for verification
# --------------------------------------------------------------------------
def reference(params, dec_inp, r, r_w_bias, r_r_bias, mask):
    qlen, bsz, d_model = dec_inp.shape
    n_head, d_head = r_w_bias.shape
    rlen = r.shape[0]

    w_heads = dec_inp @ params["w_qkv"]
    r_head_k = r @ params["w_r"]
    q_, k_, v_ = jnp.split(w_heads, 3, axis=-1)
    q_ = q_.reshape(qlen, bsz, n_head, d_head)
    k_ = k_.reshape(qlen, bsz, n_head, d_head)
    v_ = v_.reshape(qlen, bsz, n_head, d_head)
    rk = r_head_k.reshape(rlen, n_head, d_head)

    AC = jnp.einsum("ibnd,jbnd->ijbn", q_ + r_w_bias, k_)
    BD = jnp.einsum("ibnd,jnd->ijbn", q_ + r_r_bias, rk)
    zero_pad = jnp.zeros((qlen, 1, bsz, n_head), BD.dtype)
    BDp = jnp.concatenate([zero_pad, BD], axis=1)
    BDp = BDp.reshape(rlen + 1, qlen, bsz, n_head)
    BD = BDp[1:].reshape(qlen, rlen, bsz, n_head)

    score = (AC + BD) * (1.0 / math.sqrt(d_head))
    score = jnp.where(mask[:, :, None, None] != 0, -jnp.inf, score)
    prob = jax.nn.softmax(score, axis=1)
    av = jnp.einsum("ijbn,jbnd->ibnd", prob, v_)
    av = av.reshape(qlen, bsz, n_head * d_head)
    attn_out = av @ params["w_o"]

    def ln(x, g, b):
        mu = x.mean(-1, keepdims=True)
        var = ((x - mu) ** 2).mean(-1, keepdims=True)
        return (x - mu) / jnp.sqrt(var + LN_EPS) * g + b

    o1 = ln(dec_inp + attn_out, params["ln1_g"][0], params["ln1_b"][0])
    h = jnp.maximum(o1 @ params["w_ff1"] + params["b_ff1"][0], 0.0)
    h2 = h @ params["w_ff2"] + params["b_ff2"][0]
    return ln(o1 + h2, params["ln2_g"][0], params["ln2_b"][0])


# --------------------------------------------------------------------------
# Main
# --------------------------------------------------------------------------
if __name__ == "__main__":
    # Tile-friendly small shapes (lane-aligned Q so the XLU roll path is exercised).
    n_head, d_model, d_head, d_inner = 4, 128, 64, 256
    qlen, bsz = 128, 2
    rlen = klen = qlen  # mems=None

    key = jax.random.PRNGKey(0)
    ks = jax.random.split(key, 16)
    nrm = lambda k, shape, s=0.02: s * jax.random.normal(k, shape, jnp.float32)

    params = {
        # weights stored pre-transposed (x @ W), matching nn.Linear(W x^T)^T
        "w_qkv": nrm(ks[0], (d_model, 3 * n_head * d_head)),
        "w_r": nrm(ks[1], (d_model, n_head * d_head)),
        "w_o": nrm(ks[2], (n_head * d_head, d_model)),
        "ln1_g": 1.0 + nrm(ks[3], (1, d_model), 0.1),
        "ln1_b": nrm(ks[4], (1, d_model), 0.1),
        "w_ff1": nrm(ks[5], (d_model, d_inner)),
        "b_ff1": nrm(ks[6], (1, d_inner)),
        "w_ff2": nrm(ks[7], (d_inner, d_model)),
        "b_ff2": nrm(ks[8], (1, d_model)),
        "ln2_g": 1.0 + nrm(ks[9], (1, d_model), 0.1),
        "ln2_b": nrm(ks[10], (1, d_model), 0.1),
    }

    dec_inp = jax.random.normal(ks[11], (qlen, bsz, d_model), jnp.float32)
    r = jax.random.normal(ks[12], (rlen, d_model), jnp.float32)
    r_w_bias = 0.1 * jax.random.normal(ks[13], (n_head, d_head), jnp.float32)
    r_r_bias = 0.1 * jax.random.normal(ks[14], (n_head, d_head), jnp.float32)
    dec_attn_mask = jnp.triu(jnp.ones((qlen, klen), jnp.int32), k=1)  # 1 = masked

    out = rel_partial_decoder_layer(
        params, dec_inp, r, r_w_bias, r_r_bias, dec_attn_mask
    )
    out = jax.block_until_ready(out)

    ref = reference(params, dec_inp, r, r_w_bias, r_r_bias, dec_attn_mask)
    assert out.shape == (qlen, bsz, d_model)
    max_err = float(jnp.max(jnp.abs(out - ref)))
    assert jnp.allclose(out, ref, atol=3e-2, rtol=3e-2), max_err

    print("KERNEL_OK")
</pallas_src>

<mosaic_0001>
module attributes {stable_mosaic.version = 11 : i64} {
  func.func @_mm_kernel(%arg0: i32, %arg1: i32, %arg2: i32, %arg3: memref<256x128xbf16, #tpu.memory_space<vmem>>, %arg4: memref<128x256xbf16, #tpu.memory_space<vmem>>, %arg5: memref<256x256xbf16, #tpu.memory_space<vmem>>, %arg6: memref<256x256xf32, #tpu.memory_space<vmem>>) attributes {dimension_semantics = [#tpu.dimension_semantics<parallel>, #tpu.dimension_semantics<parallel>, #tpu.dimension_semantics<arbitrary>], iteration_bounds = array<i64: 1, 3, 1>, scalar_prefetch = 0 : i64, scratch_operands = 1 : i64, tpu.core_type = #tpu.core_type<tc>, window_params = [{transform_indices = @transform_0, window_bounds = array<i64: 256, 128>}, {transform_indices = @transform_1, window_bounds = array<i64: 128, 256>}, {transform_indices = @transform_2, window_bounds = array<i64: 256, 256>}]} {
    %c0_i32 = arith.constant 0 : i32
    %0 = arith.cmpi eq, %arg2, %c0_i32 : i32
    %1 = arith.extui %0 : i1 to i32
    %c0_i32_0 = arith.constant 0 : i32
    %2 = arith.cmpi ne, %1, %c0_i32_0 : i32
    scf.if %2 {
      %cst_10 = arith.constant 0.000000e+00 : f32
      %12 = vector.broadcast %cst_10 : f32 to vector<256x256xf32>
      %c0_11 = arith.constant 0 : index
      %c0_12 = arith.constant 0 : index
      %13 = vector.load %arg6[%c0_11, %c0_12] : memref<256x256xf32, #tpu.memory_space<vmem>>, vector<256x256xf32>
      tpu.vector_store %arg6[%c0_11, %c0_12], %12 {strides = array<i32>} : memref<256x256xf32, #tpu.memory_space<vmem>>, vector<256x256xf32>,
    } else {
    }
    %c0 = arith.constant 0 : index
    %c0_1 = arith.constant 0 : index
    %3 = vector.load %arg6[%c0, %c0_1] : memref<256x256xf32, #tpu.memory_space<vmem>>, vector<256x256xf32>
    %c0_2 = arith.constant 0 : index
    %c0_3 = arith.constant 0 : index
    %4 = vector.load %arg3[%c0_2, %c0_3] : memref<256x128xbf16, #tpu.memory_space<vmem>>, vector<256x128xbf16>
    %c0_4 = arith.constant 0 : index
    %c0_5 = arith.constant 0 : index
    %5 = vector.load %arg4[%c0_4, %c0_5] : memref<128x256xbf16, #tpu.memory_space<vmem>>, vector<128x256xbf16>
    %cst = arith.constant dense<0.000000e+00> : vector<256x256xf32>
    %6 = tpu.matmul %4, %5, %cst {dimension_numbers = #tpu.dot_dimension_numbers<[1], [0], [0], [1], [0, 0, 1, 1], [], []>} : vector<256x128xbf16>, vector<128x256xbf16>, vector<256x256xf32> -> vector<256x256xf32>
    %7 = arith.addf %3, %6 : vector<256x256xf32>
    %c0_6 = arith.constant 0 : index
    %c0_7 = arith.constant 0 : index
    %8 = vector.load %arg6[%c0_6, %c0_7] : memref<256x256xf32, #tpu.memory_space<vmem>>, vector<256x256xf32>
    tpu.vector_store %arg6[%c0_6, %c0_7], %7 {strides = array<i32>} : memref<256x256xf32, #tpu.memory_space<vmem>>, vector<256x256xf32>,
    %c0_i32_8 = arith.constant 0 : i32
    %9 = arith.cmpi eq, %arg2, %c0_i32_8 : i32
    %10 = arith.extui %9 : i1 to i32
    %c0_i32_9 = arith.constant 0 : i32
    %11 = arith.cmpi ne, %10, %c0_i32_9 : i32
    scf.if %11 {
      %c0_10 = arith.constant 0 : index
      %c0_11 = arith.constant 0 : index
      %12 = vector.load %arg6[%c0_10, %c0_11] : memref<256x256xf32, #tpu.memory_space<vmem>>, vector<256x256xf32>
      %13 = arith.truncf %12 : vector<256x256xf32> to vector<256x256xbf16>
      %c0_12 = arith.constant 0 : index
      %c0_13 = arith.constant 0 : index
      %14 = vector.load %arg5[%c0_12, %c0_13] : memref<256x256xbf16, #tpu.memory_space<vmem>>, vector<256x256xbf16>
      tpu.vector_store %arg5[%c0_12, %c0_13], %13 {strides = array<i32>} : memref<256x256xbf16, #tpu.memory_space<vmem>>, vector<256x256xbf16>,
    } else {
    }
    return
  }
  func.func @transform_0(%arg0: i32, %arg1: i32, %arg2: i32) -> (i32, i32) {
    %c0_i32 = arith.constant 0 : i32
    return %arg0, %arg2 : i32, i32
  }
  func.func @transform_1(%arg0: i32, %arg1: i32, %arg2: i32) -> (i32, i32) {
    %c0_i32 = arith.constant 0 : i32
    return %arg2, %arg1 : i32, i32
  }
  func.func @transform_2(%arg0: i32, %arg1: i32, %arg2: i32) -> (i32, i32) {
    %c0_i32 = arith.constant 0 : i32
    return %arg0, %arg1 : i32, i32
  }
}

</mosaic_0001>

<bundles_post_ra>
// kernel: tpu_custom_call.1
= control target key start
LH: loop header
LB: loop body
LE: loop exit
PB: predicated region body
PF: predicated region fallthrough
CT: control target
= control target key end

     0   :  { %7 = vsyncpa [#allocation4], 0  ;;  %s1806_s0 = inlined_call_operand.hbm [shape: bf16[256,128], index: 0, kind: input, shape index: {}]   ;;  %s1807_s1 = inlined_call_operand.hbm [shape: bf16[128,768], index: 1, kind: input, shape index: {}]   ;;  %s1808_s2 = inlined_call_operand.hbm [shape: bf16[256,768], index: 2, kind: output, shape index: {}]  }
   0x1   :  { %8 = vsyncpa [#allocation7], 0 }
   0x2   :  { %10 = vsyncpa [#allocation7 + $0x1], 0 }
   0x3   :  { %11 = vsyncpa [#allocation5], 0 }
   0x4   :  { %13 = vsyncpa [#allocation5 + $0x1], 0  ;;  %s1589_s9 = smov 0   ;;  %s1591_s10 = smov 0  }
   0x5   :  { %s1593_s11 = smov 0   ;;  %s1595_s12 = smov 0  }
   0x6   :  { %s1597_s13 = smov 0   ;;  %s1599_s14 = smov 0  }
   0x7 LB: > { %s1141_s15 = sadd.s32 4294967295, %s1563_s14   ;;  %s1142_s16 = sadd.s32 4294967294, %s1563_s14   ;;  %s1563_s14 = sphi %s1599_s14, %s19_s14   ;;  %s1559_s13 = sphi %s1597_s13, %s1820_s13   ;;  %s1555_s12 = sphi %s1595_s12, %s1819_s12   ;;  %s1551_s11 = sphi %s1593_s11, %s1818_s11   ;;  %s1547_s10 = sphi %s1591_s10, %s1817_s10   ;;  %s1543_s9 = sphi %s1589_s9, %s1816_s9  }
   0x8   : > { %p88_p0 = scmp.ne.s32.totalorder %s1547_s10, %s1543_s9  ;;  %p1623_p1 = scmp.eq.s32.totalorder %s1141_s15, 0 }
   0x9   : > { %p1627_p2 = scmp.eq.s32.totalorder %s1141_s15, 2  ;;  %p120_p3 = scmp.eq.s32.totalorder %s1142_s16, 2 }
   0xa   : > { %p1633_p4 = por %p1623_p1, %p88_p0  ;;  %p1143_p5 = scmp.ge.s32.totalorder %s1563_s14, 1 }
   0xb   : > { %p1638_p6 = por %p120_p3, %p88_p0  ;;  %p127_p7 = scmp.lt.s32.totalorder %s1563_s14, 4 }
   0xc   : > { %s142_s23 = sshll.u32 %s1806_s0, 4  ;;  %s1565_s25 = smov [#allocation3]   ;;  %s143_s23 = int_to_ptr.hbm [resolvable:$true] %s142_s23 }
   0xd   : > { %p1646_p8 = pnand %p1143_p5, %p127_p7  ;;  %s144_s26 = sshll.u32 %s1565_s25, 4  ;;  %s145_s26 = int_to_ptr.vmem [resolvable:$true] %s144_s26 }
   0xe   : > { %s1566_s27 = smov 64   ;;  %s1567_s28 = smov 4  }
   0xf   : > { %p1344_p9 = pneg %p1646_p8  ;;  %s34_s29 = sadd.s32 1, %s1559_s13 }
  0x10   : > { %p36_p11 = scmp.ge.s32.totalorder %s34_s29, 3  ;;  %s75_s30 = sadd.s32 1, %s1551_s11 }
  0x11   : > { %p1345_p10 = pnand %p1344_p9, %p1623_p1  ;;  %p82_p12 = scmp.ne.s32.totalorder %s1551_s11, %s1547_s10 }
  0x12   : > { %p83_p13 = scmp.eq.s32.totalorder %s1563_s14, 0  ;;  %s1822_s29 = smov (%p36_p11, %s34_s29), 0 }
  0x13   : > { %1347 = dma.hbm_to_vmem [thread:$0]  (!%p1345_p10), %s143_s23, 2048, %s145_s26, [#allocation4], %s1566_s27, %s1566_s27, %s1567_s28  }
  0x14   : > { %p1661_p0 = por %p83_p13, %p82_p12  ;;  %p1667_p3 = por %p1627_p2, %p82_p12 }
  0x15   : > { %s71_s5 = ssub.s32 %s1559_s13, %s1822_s29  ;;  %p1357_p5 = scmp.lt.s32.totalorder %s1563_s14, 3 }
  0x16   : > { %p73_p7 = scmp.eq.s32.totalorder %s71_s5, 0  ;;  %s158_s6 = sand.u32 1, %s1551_s11  }
  0x17   : > { %s1146_s7 = sshll.u32 %s158_s6, 7  ;;  %s1286_s15 = sshll.u32 %s1559_s13, 3 }
  0x18   : > { %s1676_s8 = scalar_select %p73_p7, %s1551_s11, %s75_s30  }
  0x19   : > { %s170_s22 = scalar_lea.hbm %s1807_s1, %s1286_s15  ;;  %s162_s23 = scalar_lea.vmem [#allocation6], %s1146_s7 }
  0x1a   : > { %s173_s25 = sshll.u32 %s162_s23, 4  ;;  %s171_s18 = sshll.u32 %s170_s22, 4  ;;  %s174_s25 = int_to_ptr.vmem [resolvable:$true] %s173_s25  ;;  %s172_s18 = int_to_ptr.hbm [resolvable:$true] %s171_s18 }
  0x1b   : > { %p1349_p2 = pnand %p1357_p5, %p1661_p0  ;;  %s159_s26 = scalar_lea.sflag [#allocation7], %s158_s6 }
  0x1c   : > { %s1568_s27 = smov 384   ;;  %s1569_s28 = smov 128  }
  0x1d   : > { %s1570_s5 = smov 8   ;;  %185 = sbr.rel (%p1646_p8) target bundleno = 333 (0x14d), region = 28 }
  0x1e   : > { %1351 = dma.hbm_to_vmem [thread:$0]  (!%p1349_p2), %s172_s18, 2048, %s174_s25, %s159_s26, %s1568_s27, %s1569_s28, %s1570_s5  }
  0x22   : > { %1530 = dma.done.wait (%p1623_p1), [#allocation4], 2048  }
  0x23   : > { %1532 = vsyncadd (%p1623_p1), [#allocation4], 4294965248  ;;  %s1691_s30 = sand.u32 1, %s1547_s10  }
  0x24   : > { %s1151_s3 = sshll.u32 %s1691_s30, 7  ;;  %s193_s6 = scalar_lea.sflag [#allocation7], %s1691_s30 }
  0x25   : > { %s1695_s7 = scalar_lea.vmem [#allocation6], %s1151_s3 }
  0x26   : > { %1534 = dma.done.wait (%p1633_p4), %s193_s6, 2048  }
  0x27   : > { %1536 = vsyncadd (%p1633_p4), %s193_s6, 4294965248  ;;  %v1275_v0 = vld [vmem:[%s1695_s7 + $0x70] sm:$0xf]  ;;  %v1318_v1 = vld [vmem:[%s1695_s7 + $0x74] sm:$0xf0]  ;;  %s1152_s17 = sshll.u32 %s1691_s30, 8 }
  0x28   : > { %v1317_v2 = vld [vmem:[%s1695_s7 + $0x74] sm:$0xf]  ;;  %v1276_v3 = vor.u32 %v1318_v1, %v1275_v0  ;;  %v1277_v4 = vld [vmem:[%s1695_s7 + $0x78] sm:$0xf0]  ;;  %v1267_v5 = vld [vmem:[%s1695_s7 + $0x60] sm:$0xf] }
  0x29   : > { %v1316_v6 = vld [vmem:[%s1695_s7 + $0x64] sm:$0xf0]  ;;  %v1280_v7 = vor.u32 %v1317_v2, %v1277_v4  ;;  %v1315_v8 = vld [vmem:[%s1695_s7 + $0x64] sm:$0xf]  ;;  %v1269_v9 = vld [vmem:[%s1695_s7 + $0x68] sm:$0xf0] }
  0x2a   : > { %579 = vmatpush.bf16.msra.mxu0 %v1276_v3  ;;  %1320 = vmatpush.bf16.msra.mxu2 %v1276_v3  ;;  %v1268_v10 = vor.u32 %v1316_v6, %v1267_v5  ;;  %v1272_v11 = vor.u32 %v1315_v8, %v1269_v9  ;;  %v1259_v12 = vld [vmem:[%s1695_s7 + $0x50] sm:$0xf]  ;;  %v1314_v13 = vld [vmem:[%s1695_s7 + $0x54] sm:$0xf0]  ;;  %v1313_v14 = vld [vmem:[%s1695_s7 + $0x54] sm:$0xf] }
  0x2b   : > { %668 = vmatpush.bf16.msra.mxu1 %v1280_v7  ;;  %1328 = vmatpush.bf16.msra.mxu3 %v1280_v7  ;;  %v1261_v15 = vld [vmem:[%s1695_s7 + $0x58] sm:$0xf0]  ;;  %v1260_v16 = vor.u32 %v1314_v13, %v1259_v12  ;;  %v1251_v18 = vld [vmem:[%s1695_s7 + $0x40] sm:$0xf]  ;;  %v1312_v19 = vld [vmem:[%s1695_s7 + $0x44] sm:$0xf0] }
  0x2c   : > { %v1264_v17 = vor.u32 %v1313_v14, %v1261_v15  ;;  %v1311_v20 = vld [vmem:[%s1695_s7 + $0x44] sm:$0xf]  ;;  %v1253_v21 = vld [vmem:[%s1695_s7 + $0x48] sm:$0xf0]  ;;  %v1252_v22 = vor.u32 %v1312_v19, %v1251_v18  ;;  %v1243_v24 = vld [vmem:[%s1695_s7 + $0x30] sm:$0xf] }
  0x2d   : > { %v1256_v23 = vor.u32 %v1311_v20, %v1253_v21  ;;  %v1310_v25 = vld [vmem:[%s1695_s7 + $0x34] sm:$0xf0]  ;;  %v1309_v26 = vld [vmem:[%s1695_s7 + $0x34] sm:$0xf]  ;;  %v1245_v27 = vld [vmem:[%s1695_s7 + $0x38] sm:$0xf0] }
  0x2e   : > { %580 = vmatpush.bf16.msra.mxu0 %v1268_v10  ;;  %1321 = vmatpush.bf16.msra.mxu2 %v1268_v10  ;;  %v1244_v28 = vor.u32 %v1310_v25, %v1243_v24  ;;  %v1248_v29 = vor.u32 %v1309_v26, %v1245_v27  ;;  %v1235_v30 = vld [vmem:[%s1695_s7 + $0x20] sm:$0xf]  ;;  %v1308_v31 = vld [vmem:[%s1695_s7 + $0x24] sm:$0xf0]  ;;  %v1307_v32 = vld [vmem:[%s1695_s7 + $0x24] sm:$0xf] }
  0x2f   : > { %669 = vmatpush.bf16.msra.mxu1 %v1272_v11  ;;  %1329 = vmatpush.bf16.msra.mxu3 %v1272_v11  ;;  %v1237_v33 = vld [vmem:[%s1695_s7 + $0x28] sm:$0xf0]  ;;  %v1236_v34 = vor.u32 %v1308_v31, %v1235_v30  ;;  %v1227_v36 = vld [vmem:[%s1695_s7 + $0x10] sm:$0xf]  ;;  %v1306_v37 = vld [vmem:[%s1695_s7 + $0x14] sm:$0xf0] }
  0x30   : > { %v1240_v35 = vor.u32 %v1307_v32, %v1237_v33  ;;  %v1305_v38 = vld [vmem:[%s1695_s7 + $0x14] sm:$0xf]  ;;  %v1229_v39 = vld [vmem:[%s1695_s7 + $0x18] sm:$0xf0]  ;;  %v1228_v40 = vor.u32 %v1306_v37, %v1227_v36  ;;  %v1219_v42 = vld [vmem:[%s1695_s7] sm:$0xf] }
  0x31   : > { %v1232_v41 = vor.u32 %v1305_v38, %v1229_v39  ;;  %v1304_v43 = vld [vmem:[%s1695_s7 + $0x4] sm:$0xf0]  ;;  %v1303_v44 = vld [vmem:[%s1695_s7 + $0x4] sm:$0xf]  ;;  %v1221_v45 = vld [vmem:[%s1695_s7 + $0x8] sm:$0xf0] }
  0x32   : > { %581 = vmatpush.bf16.msra.mxu0 %v1260_v16  ;;  %1322 = vmatpush.bf16.msra.mxu2 %v1260_v16  ;;  %v1220_v46 = vor.u32 %v1304_v43, %v1219_v42  ;;  %v1224_v47 = vor.u32 %v1303_v44, %v1221_v45  ;;  %v1287_v48 = vld [vmem:[#allocation3] sm:$0xff]  ;;  %v1288_v50 = vld [vmem:[#allocation3 + $0x8] sm:$0xff]  ;;  %v1289_v52 = vld [vmem:[#allocation3 + $0x10] sm:$0xff]  ;;  %s1734_s19 = scalar_lea.vmem [#allocation8], %s1152_s17  ;;  %s1319_s24 = sshll.u32 %s1555_s12, 3 }
  0x33   : > { %670 = vmatpush.bf16.msra.mxu1 %v1264_v17  ;;  %1330 = vmatpush.bf16.msra.mxu3 %v1264_v17  ;;  %v1295_v49 = vld [vmem:[#allocation3 + $0x40] sm:$0xff]  ;;  %v1296_v51 = vld [vmem:[#allocation3 + $0x48] sm:$0xff]  ;;  %v1297_v53 = vld [vmem:[#allocation3 + $0x50] sm:$0xff]  ;;  %s1031_s21 = scalar_lea.hbm %s1808_s2, %s1319_s24  ;;  %s1032_s22 = sshll.u32 %s1734_s19, 4  ;;  %s1033_s22 = int_to_ptr.vmem [resolvable:$true] %s1032_s22 }
  0x34   : > { %v1290_v54 = vld [vmem:[#allocation3 + $0x18] sm:$0xff]  ;;  %v1291_v56 = vld [vmem:[#allocation3 + $0x20] sm:$0xff]  ;;  %v1292_v58 = vld [vmem:[#allocation3 + $0x28] sm:$0xff]  ;;  %s1034_s23 = sshll.u32 %s1031_s21, 4  ;;  %s1017_s12 = scalar_lea.sflag [#allocation5], %s1691_s30  ;;  %s1035_s23 = int_to_ptr.hbm [resolvable:$true] %s1034_s23 }
  0x35   : > { %v1298_v55 = vld [vmem:[#allocation3 + $0x58] sm:$0xff]  ;;  %v1299_v57 = vld [vmem:[#allocation3 + $0x60] sm:$0xff]  ;;  %v1300_v59 = vld [vmem:[#allocation3 + $0x68] sm:$0xff]  ;;  %s1491_s25 = sshra.s32 %s1035_s23, 4  ;;  %s1497_s28 = scalar_lea.hbm %s1808_s2, 768  ;;  %s1492_s25 = int_to_ptr.hbm [resolvable:$true] %s1491_s25 }
  0x36   : > { %582 = vmatpush.bf16.msra.mxu0 %v1252_v22  ;;  %1323 = vmatpush.bf16.msra.mxu2 %v1252_v22  ;;  %v1293_v60 = vld [vmem:[#allocation3 + $0x30] sm:$0xff]  ;;  %v1294_v62 = vld [vmem:[#allocation3 + $0x38] sm:$0xff]  ;;  %s1493_s18 = scalar_lea.hbm %s1492_s25, 256  ;;  %p1498_p9 = scmp.lt.s32.totalorder %s1492_s25, %s1808_s2 }
  0x37   : > { %671 = vmatpush.bf16.msra.mxu1 %v1256_v23  ;;  %1331 = vmatpush.bf16.msra.mxu3 %v1256_v23  ;;  %v1301_v61 = vld [vmem:[#allocation3 + $0x70] sm:$0xff]  ;;  %v1302_v63 = vld [vmem:[#allocation3 + $0x78] sm:$0xff]  ;;  %p1494_p1 = scmp.ne.s32.totalorder %s1492_s25, %s1493_s18  ;;  %p1499_p10 = scmp.lt.s32.totalorder %s1497_s28, %s1493_s18 }
  0x39   : > { %p1495_p4 = pnand %p1494_p1, %p1667_p3  ;;  %p1500_p11 = por %p1499_p10, %p1498_p9 }
  0x3a   : > { %583 = vmatpush.bf16.msra.mxu0 %v1244_v28  ;;  %1324 = vmatpush.bf16.msra.mxu2 %v1244_v28 }
  0x3b   : > { %672 = vmatpush.bf16.msra.mxu1 %v1248_v29  ;;  %1332 = vmatpush.bf16.msra.mxu3 %v1248_v29  ;;  %p1496_p8 = pneg %p1495_p4 }
  0x3d   : > { %p1501_p12 = pnand %p1500_p11, %p1496_p8 }
  0x3e   : > { %584 = vmatpush.bf16.msra.mxu0 %v1236_v34  ;;  %1325 = vmatpush.bf16.msra.mxu2 %v1236_v34 }
  0x3f   : > { %673 = vmatpush.bf16.msra.mxu1 %v1240_v35  ;;  %1333 = vmatpush.bf16.msra.mxu3 %v1240_v35 }
  0x42   : > { %585 = vmatpush.bf16.msra.mxu0 %v1228_v40  ;;  %1326 = vmatpush.bf16.msra.mxu2 %v1228_v40 }
  0x43   : > { %674 = vmatpush.bf16.msra.mxu1 %v1232_v41  ;;  %1334 = vmatpush.bf16.msra.mxu3 %v1232_v41 }
  0x46   : > { %586 = vmatpush.bf16.msra.mxu0 %v1220_v46  ;;  %1327 = vmatpush.bf16.msra.mxu2 %v1220_v46 }
  0x47   : > { %675 = vmatpush.bf16.msra.mxu1 %v1224_v47  ;;  %1335 = vmatpush.bf16.msra.mxu3 %v1224_v47 }
  0x49   : > { %587 = vmatmul.bf16.vlgmr.msra.gmra.mxu0 %v1287_v48  ;;  %627 = vmatmul.bf16.vlgmr.msra.gmra.mxu2 %v1295_v49 }
  0x4a   : > { %676 = vmatmul.bf16.vlgmr.msra.gmra.mxu1 %v1287_v48  ;;  %716 = vmatmul.bf16.vlgmr.msra.gmra.mxu3 %v1295_v49 }
  0x59   : > { %592 = vmatmul.bf16.gmra.mxu0 %v1288_v50  ;;  %632 = vmatmul.bf16.gmra.mxu2 %v1296_v51 }
  0x5a   : > { %681 = vmatmul.bf16.gmra.mxu1 %v1288_v50  ;;  %721 = vmatmul.bf16.gmra.mxu3 %v1296_v51 }
  0x69   : > { %597 = vmatmul.bf16.gmra.mxu0 %v1289_v52  ;;  %637 = vmatmul.bf16.gmra.mxu2 %v1297_v53 }
  0x6a   : > { %686 = vmatmul.bf16.gmra.mxu1 %v1289_v52  ;;  %726 = vmatmul.bf16.gmra.mxu3 %v1297_v53 }
  0x79   : > { %602 = vmatmul.bf16.gmra.mxu0 %v1290_v54  ;;  %642 = vmatmul.bf16.gmra.mxu2 %v1298_v55 }
  0x7a   : > { %691 = vmatmul.bf16.gmra.mxu1 %v1290_v54  ;;  %731 = vmatmul.bf16.gmra.mxu3 %v1298_v55 }
  0x89   : > { %607 = vmatmul.bf16.gmra.mxu0 %v1291_v56  ;;  %647 = vmatmul.bf16.gmra.mxu2 %v1299_v57 }
  0x8a   : > { %696 = vmatmul.bf16.gmra.mxu1 %v1291_v56  ;;  %736 = vmatmul.bf16.gmra.mxu3 %v1299_v57 }
  0x99   : > { %612 = vmatmul.bf16.gmra.mxu0 %v1292_v58  ;;  %652 = vmatmul.bf16.gmra.mxu2 %v1300_v59 }
  0x9a   : > { %701 = vmatmul.bf16.gmra.mxu1 %v1292_v58  ;;  %741 = vmatmul.bf16.gmra.mxu3 %v1300_v59 }
  0xa9   : > { %617 = vmatmul.bf16.gmra.mxu0 %v1293_v60  ;;  %657 = vmatmul.bf16.gmra.mxu2 %v1301_v61 }
  0xaa   : > { %706 = vmatmul.bf16.gmra.mxu1 %v1293_v60  ;;  %746 = vmatmul.bf16.gmra.mxu3 %v1301_v61 }
  0xb9   : > { %622 = vmatmul.bf16.gmra.mxu0 %v1294_v62  ;;  %662 = vmatmul.bf16.gmra.mxu2 %v1302_v63 }
  0xba   : > { %711 = vmatmul.bf16.gmra.mxu1 %v1294_v62  ;;  %751 = vmatmul.bf16.gmra.mxu3 %v1302_v63 }
  0xc6   : > { %v588_v0 = vpop.f32.mrf.mxu0 }
  0xc7   : > { %v677_v1 = vpop.f32.mrf.mxu1 }
  0xc8   : > { %v952_v2 = vpack.c.bf16 %v677_v1, %v588_v0 }
  0xca   : > { %984 = vst [vmem:[%s1734_s19] sm:$0xff] %v952_v2 }
  0xcc   : > { %v628_v3 = vpop.f32.mrf.mxu2 }
  0xcd   : > { %v717_v4 = vpop.f32.mrf.mxu3 }
  0xce   : > { %v968_v5 = vpack.c.bf16 %v717_v4, %v628_v3  ;;  %v590_v6 = vpop.f32.mrf.mxu0 }
  0xcf   : > { %v679_v7 = vpop.f32.mrf.mxu1 }
  0xd0   : > { %1000 = vst [vmem:[%s1734_s19 + $0x80] sm:$0xff] %v968_v5  ;;  %v953_v8 = vpack.c.bf16 %v679_v7, %v590_v6 }
  0xd2   : > { %985 = vst [vmem:[%s1734_s19 + $0x8] sm:$0xff] %v953_v8 }
  0xd4   : > { %v630_v9 = vpop.f32.mrf.mxu2 }
  0xd5   : > { %v719_v10 = vpop.f32.mrf.mxu3 }
  0xd6   : > { %v969_v11 = vpack.c.bf16 %v719_v10, %v630_v9  ;;  %v593_v12 = vpop.f32.mrf.mxu0 }
  0xd7   : > { %v682_v13 = vpop.f32.mrf.mxu1 }
  0xd8   : > { %1001 = vst [vmem:[%s1734_s19 + $0x88] sm:$0xff] %v969_v11  ;;  %v954_v14 = vpack.c.bf16 %v682_v13, %v593_v12 }
  0xda   : > { %986 = vst [vmem:[%s1734_s19 + $0x10] sm:$0xff] %v954_v14 }
  0xdc   : > { %v633_v15 = vpop.f32.mrf.mxu2 }
  0xdd   : > { %v722_v16 = vpop.f32.mrf.mxu3 }
  0xde   : > { %v970_v17 = vpack.c.bf16 %v722_v16, %v633_v15  ;;  %v595_v18 = vpop.f32.mrf.mxu0 }
  0xdf   : > { %v684_v19 = vpop.f32.mrf.mxu1 }
  0xe0   : > { %1002 = vst [vmem:[%s1734_s19 + $0x90] sm:$0xff] %v970_v17  ;;  %v955_v20 = vpack.c.bf16 %v684_v19, %v595_v18 }
  0xe2   : > { %987 = vst [vmem:[%s1734_s19 + $0x18] sm:$0xff] %v955_v20 }
  0xe4   : > { %v635_v21 = vpop.f32.mrf.mxu2 }
  0xe5   : > { %v724_v22 = vpop.f32.mrf.mxu3 }
  0xe6   : > { %v971_v23 = vpack.c.bf16 %v724_v22, %v635_v21  ;;  %v598_v24 = vpop.f32.mrf.mxu0 }
  0xe7   : > { %v687_v25 = vpop.f32.mrf.mxu1 }
  0xe8   : > { %1003 = vst [vmem:[%s1734_s19 + $0x98] sm:$0xff] %v971_v23  ;;  %v956_v26 = vpack.c.bf16 %v687_v25, %v598_v24 }
  0xea   : > { %988 = vst [vmem:[%s1734_s19 + $0x20] sm:$0xff] %v956_v26 }
  0xec   : > { %v638_v27 = vpop.f32.mrf.mxu2 }
  0xed   : > { %v727_v28 = vpop.f32.mrf.mxu3 }
  0xee   : > { %v972_v29 = vpack.c.bf16 %v727_v28, %v638_v27  ;;  %v600_v30 = vpop.f32.mrf.mxu0 }
  0xef   : > { %v689_v31 = vpop.f32.mrf.mxu1 }
  0xf0   : > { %1004 = vst [vmem:[%s1734_s19 + $0xa0] sm:$0xff] %v972_v29  ;;  %v957_v32 = vpack.c.bf16 %v689_v31, %v600_v30 }
  0xf2   : > { %989 = vst [vmem:[%s1734_s19 + $0x28] sm:$0xff] %v957_v32 }
  0xf4   : > { %v640_v33 = vpop.f32.mrf.mxu2 }
  0xf5   : > { %v729_v34 = vpop.f32.mrf.mxu3 }
  0xf6   : > { %v973_v35 = vpack.c.bf16 %v729_v34, %v640_v33  ;;  %v603_v36 = vpop.f32.mrf.mxu0 }
  0xf7   : > { %v692_v37 = vpop.f32.mrf.mxu1 }
  0xf8   : > { %1005 = vst [vmem:[%s1734_s19 + $0xa8] sm:$0xff] %v973_v35  ;;  %v958_v38 = vpack.c.bf16 %v692_v37, %v603_v36 }
  0xfa   : > { %990 = vst [vmem:[%s1734_s19 + $0x30] sm:$0xff] %v958_v38 }
  0xfc   : > { %v643_v39 = vpop.f32.mrf.mxu2 }
  0xfd   : > { %v732_v40 = vpop.f32.mrf.mxu3 }
  0xfe   : > { %v974_v41 = vpack.c.bf16 %v732_v40, %v643_v39  ;;  %v605_v42 = vpop.f32.mrf.mxu0 }
  0xff   : > { %v694_v43 = vpop.f32.mrf.mxu1 }
 0x100   : > { %1006 = vst [vmem:[%s1734_s19 + $0xb0] sm:$0xff] %v974_v41  ;;  %v959_v44 = vpack.c.bf16 %v694_v43, %v605_v42 }
 0x102   : > { %991 = vst [vmem:[%s1734_s19 + $0x38] sm:$0xff] %v959_v44 }
 0x104   : > { %v645_v45 = vpop.f32.mrf.mxu2 }
 0x105   : > { %v734_v46 = vpop.f32.mrf.mxu3 }
 0x106   : > { %v975_v47 = vpack.c.bf16 %v734_v46, %v645_v45  ;;  %v608_v48 = vpop.f32.mrf.mxu0 }
 0x107   : > { %v697_v49 = vpop.f32.mrf.mxu1 }
 0x108   : > { %1007 = vst [vmem:[%s1734_s19 + $0xb8] sm:$0xff] %v975_v47  ;;  %v960_v50 = vpack.c.bf16 %v697_v49, %v608_v48 }
 0x10a   : > { %992 = vst [vmem:[%s1734_s19 + $0x40] sm:$0xff] %v960_v50 }
 0x10c   : > { %v648_v51 = vpop.f32.mrf.mxu2 }
 0x10d   : > { %v737_v52 = vpop.f32.mrf.mxu3 }
 0x10e   : > { %v976_v53 = vpack.c.bf16 %v737_v52, %v648_v51  ;;  %v610_v54 = vpop.f32.mrf.mxu0 }
 0x10f   : > { %v699_v55 = vpop.f32.mrf.mxu1 }
 0x110   : > { %1008 = vst [vmem:[%s1734_s19 + $0xc0] sm:$0xff] %v976_v53  ;;  %v961_v56 = vpack.c.bf16 %v699_v55, %v610_v54 }
 0x112   : > { %993 = vst [vmem:[%s1734_s19 + $0x48] sm:$0xff] %v961_v56 }
 0x114   : > { %v650_v57 = vpop.f32.mrf.mxu2 }
 0x115   : > { %v739_v58 = vpop.f32.mrf.mxu3 }
 0x116   : > { %v977_v59 = vpack.c.bf16 %v739_v58, %v650_v57  ;;  %v613_v60 = vpop.f32.mrf.mxu0 }
 0x117   : > { %v702_v61 = vpop.f32.mrf.mxu1 }
 0x118   : > { %1009 = vst [vmem:[%s1734_s19 + $0xc8] sm:$0xff] %v977_v59  ;;  %v962_v62 = vpack.c.bf16 %v702_v61, %v613_v60 }
 0x11a   : > { %994 = vst [vmem:[%s1734_s19 + $0x50] sm:$0xff] %v962_v62 }
 0x11c   : > { %v653_v63 = vpop.f32.mrf.mxu2 }
 0x11d   : > { %v742_v0 = vpop.f32.mrf.mxu3 }
 0x11e   : > { %v978_v1 = vpack.c.bf16 %v742_v0, %v653_v63  ;;  %v615_v2 = vpop.f32.mrf.mxu0 }
 0x11f   : > { %v704_v3 = vpop.f32.mrf.mxu1 }
 0x120   : > { %1010 = vst [vmem:[%s1734_s19 + $0xd0] sm:$0xff] %v978_v1  ;;  %v963_v4 = vpack.c.bf16 %v704_v3, %v615_v2 }
 0x122   : > { %995 = vst [vmem:[%s1734_s19 + $0x58] sm:$0xff] %v963_v4 }
 0x124   : > { %v655_v5 = vpop.f32.mrf.mxu2 }
 0x125   : > { %v744_v6 = vpop.f32.mrf.mxu3 }
 0x126   : > { %v979_v7 = vpack.c.bf16 %v744_v6, %v655_v5  ;;  %v618_v8 = vpop.f32.mrf.mxu0 }
 0x127   : > { %v707_v9 = vpop.f32.mrf.mxu1 }
 0x128   : > { %1011 = vst [vmem:[%s1734_s19 + $0xd8] sm:$0xff] %v979_v7  ;;  %v964_v10 = vpack.c.bf16 %v707_v9, %v618_v8 }
 0x12a   : > { %996 = vst [vmem:[%s1734_s19 + $0x60] sm:$0xff] %v964_v10 }
 0x12c   : > { %v658_v11 = vpop.f32.mrf.mxu2 }
 0x12d   : > { %v747_v12 = vpop.f32.mrf.mxu3 }
 0x12e   : > { %v980_v13 = vpack.c.bf16 %v747_v12, %v658_v11  ;;  %v620_v14 = vpop.f32.mrf.mxu0 }
 0x12f   : > { %v709_v15 = vpop.f32.mrf.mxu1 }
 0x130   : > { %1012 = vst [vmem:[%s1734_s19 + $0xe0] sm:$0xff] %v980_v13  ;;  %v965_v16 = vpack.c.bf16 %v709_v15, %v620_v14 }
 0x132   : > { %997 = vst [vmem:[%s1734_s19 + $0x68] sm:$0xff] %v965_v16 }
 0x134   : > { %v660_v17 = vpop.f32.mrf.mxu2 }
 0x135   : > { %v749_v18 = vpop.f32.mrf.mxu3 }
 0x136   : > { %v981_v19 = vpack.c.bf16 %v749_v18, %v660_v17  ;;  %v623_v20 = vpop.f32.mrf.mxu0 }
 0x137   : > { %v712_v21 = vpop.f32.mrf.mxu1 }
 0x138   : > { %1013 = vst [vmem:[%s1734_s19 + $0xe8] sm:$0xff] %v981_v19  ;;  %v966_v22 = vpack.c.bf16 %v712_v21, %v623_v20 }
 0x13a   : > { %998 = vst [vmem:[%s1734_s19 + $0x70] sm:$0xff] %v966_v22 }
 0x13c   : > { %v663_v23 = vpop.f32.mrf.mxu2 }
 0x13d   : > { %v752_v24 = vpop.f32.mrf.mxu3 }
 0x13e   : > { %v982_v25 = vpack.c.bf16 %v752_v24, %v663_v23  ;;  %v625_v26 = vpop.f32.mrf.mxu0 }
 0x13f   : > { %v714_v27 = vpop.f32.mrf.mxu1 }
 0x140   : > { %1014 = vst [vmem:[%s1734_s19 + $0xf0] sm:$0xff] %v982_v25  ;;  %v967_v28 = vpack.c.bf16 %v714_v27, %v625_v26 }
 0x142   : > { %999 = vst [vmem:[%s1734_s19 + $0x78] sm:$0xff] %v967_v28 }
 0x144   : > { %v665_v29 = vpop.f32.mrf.mxu2 }
 0x145   : > { %v754_v30 = vpop.f32.mrf.mxu3 }
 0x146   : > { %v983_v31 = vpack.c.bf16 %v754_v30, %v665_v29 }
 0x148   : > { %1015 = vst [vmem:[%s1734_s19 + $0xf8] sm:$0xff] %v983_v31 }
 0x149   : > { %1504 = shalt.err (!%p1501_p12)
}
 0x14a   : > { %s1571_s30 = smov 128   ;;  %s1572_s6 = smov 384  }
 0x14b   : > { %s1573_s7 = smov 8  }
 0x14c   : > { %1342 = dma.vmem_to_hbm [thread:$0]  (%p1667_p3), %s1033_s22, 4096, %s1035_s23, %s1017_s12, %s1571_s30, %s1572_s6, %s1573_s7  }
 0x14d PF: > { %p1359_p13 = scmp.ge.s32.totalorder %s1563_s14, 2  ;;  %s1049_s17 = sand.u32 1, %s1543_s9  }
 0x14e   : > { %s1050_s19 = scalar_lea.sflag [#allocation5], %s1049_s17 }
 0x14f   : > { %p1353_p0 = pnand %p1359_p13, %p1638_p6 }
 0x151   : > { %p1354_p5 = pneg %p1353_p0 }
 0x153   : > { %1538 = dma.done.wait (%p1354_p5), %s1050_s19, 4096  }
 0x154   : > { %1540 = vsyncadd (%p1354_p5), %s1050_s19, 4294963200  ;;  %s19_s14 = sadd.s32 1, %s1563_s14   ;;  %s1816_s9 = smov %s1547_s10 }
 0x155   : > { %p16_p7 = scmp.ge.s32.totalorder %s19_s14, 5   ;;  %s1817_s10 = smov %s1551_s11 }
 0x156   : > { %s1818_s11 = smov %s1676_s8  ;;  %s1819_s12 = smov %s1559_s13 }
 0x157   : > { %s1820_s13 = smov %s1822_s29  ;;  %18 = sbr.rel (!%p16_p7) target bundleno = 7 (0x7), region = 87 }
 0x15c   :  { %1056 = vsyncpa [#allocation4], 1 }
 0x15d   :  { %1058 = vsyncpa [#allocation4 + $0x1], 1 }
 0x15e   :  { %1059 = vsyncpa [#allocation7], 1 }
 0x15f   :  { %1061 = vsyncpa [#allocation7 + $0x1], 1 }
 0x160   :  { %1062 = vsyncpa [#allocation5], 1 }
 0x161   :  { %1064 = vsyncpa [#allocation5 + $0x1], 1 }

</bundles_post_ra>
